<compile_context>
chip_gen: v7x
topology: tpu7x:2x2x1
jax: 0.10.0
libtpu: 0.0.40
codegen_flags: <defaults>
</compile_context>

<pallas_src>
import functools
import math

import jax
import jax.numpy as jnp
from jax.experimental import pallas as pl
from jax.experimental.pallas import tpu as pltpu


def _qnet_kernel(x_ref, w1_ref, b1_ref, w2_ref, b2_ref, wh_ref, bh_ref,
                 q_ref, *, action_size):
    x = x_ref[...]

    # fc1 + ReLU
    h1 = jnp.dot(x, w1_ref[...], preferred_element_type=jnp.float32) + b1_ref[...]
    h1 = jnp.maximum(h1, 0.0)

    # fc2 + ReLU
    h2 = jnp.dot(h1, w2_ref[...], preferred_element_type=jnp.float32) + b2_ref[...]
    h2 = jnp.maximum(h2, 0.0)

    # Fused heads: one matmul producing [B, action_size + 1]
    #   columns [0, action_size)           -> Advantage
    #   column  [action_size, action_size] -> Critic
    heads = jnp.dot(h2, wh_ref[...], preferred_element_type=jnp.float32) + bh_ref[...]
    adv = heads[:, :action_size]                       # lane-aligned at 0
    critic = heads[:, action_size:action_size + 1]     # single lane select

    # Dueling combination: Q = C + A - mean(A, dim=1, keepdim=True)
    adv_mean = jnp.mean(adv, axis=-1, keepdims=True)
    q_ref[...] = critic + adv - adv_mean


def qnetwork_forward(state, params, *, block_b=512):
    """Run the dueling-DQN forward pass as one Pallas kernel.

    state:  [B, state_size] float32
    params: dict of W1,b1,W2,b2,Wc,bc,Wa,ba (weights [in,out], biases [1,out]).
    block_b: batch-tile size once B grows large (must be a multiple of 8 and
             divide B; otherwise we fall back to a single whole-batch block).
    """
    B, state_size = state.shape
    fc1_units = params["W1"].shape[1]
    fc2_units = params["W2"].shape[1]
    action_size = params["Wa"].shape[1]
    n_heads = action_size + 1

    # Fuse the two heads into one matmul: [Wa | Wc], [ba | bc].
    w_heads = jnp.concatenate([params["Wa"], params["Wc"]], axis=1)   # [fc2, A+1]
    b_heads = jnp.concatenate([params["ba"], params["bc"]], axis=1)   # [1,   A+1]

    # Batch tiling: single block at small B, tiled + "parallel" at large B
    # (shards across both TensorCores on v7x; serial but VMEM-friendly on v5e/v6e).
    bb = B if (B <= block_b or B % block_b != 0 or block_b % 8 != 0) else block_b
    grid = (B // bb,)

    # Weights/biases stay VMEM-resident across the batch grid (block (0,0)).
    resident = lambda shape: pl.BlockSpec(shape, lambda i: (0, 0))

    in_specs = [
        pl.BlockSpec((bb, state_size), lambda i: (i, 0)),     # x
        resident((state_size, fc1_units)),                    # W1
        resident((1, fc1_units)),                             # b1
        resident((fc1_units, fc2_units)),                     # W2
        resident((1, fc2_units)),                             # b2
        resident((fc2_units, n_heads)),                       # W_heads
        resident((1, n_heads)),                               # b_heads
    ]
    out_spec = pl.BlockSpec((bb, action_size), lambda i: (i, 0))

    flops = 2 * B * (state_size * fc1_units
                     + fc1_units * fc2_units
                     + fc2_units * n_heads)
    bytes_accessed = 4 * (B * state_size                 # x
                          + state_size * fc1_units + fc1_units
                          + fc1_units * fc2_units + fc2_units
                          + fc2_units * n_heads + n_heads
                          + B * action_size)             # Q out

    return pl.pallas_call(
        functools.partial(_qnet_kernel, action_size=action_size),
        out_shape=jax.ShapeDtypeStruct((B, action_size), jnp.float32),
        grid=grid,
        in_specs=in_specs,
        out_specs=out_spec,
        compiler_params=pltpu.CompilerParams(
            dimension_semantics=("parallel",)),
        cost_estimate=pl.CostEstimate(
            flops=flops, transcendentals=0, bytes_accessed=bytes_accessed),
    )(state,
      params["W1"], params["b1"],
      params["W2"], params["b2"],
      w_heads, b_heads)


def init_params(key, state_size, action_size, fc1_units=64, fc2_units=64):
    """Deterministic init mimicking nn.Linear's default U(-1/sqrt(fan_in), +)."""
    def linear(k, fan_in, fan_out):
        kw, kb = jax.random.split(k)
        bound = 1.0 / math.sqrt(fan_in)
        w = jax.random.uniform(kw, (fan_in, fan_out), jnp.float32, -bound, bound)
        b = jax.random.uniform(kb, (1, fan_out), jnp.float32, -bound, bound)
        return w, b

    k1, k2, k3, k4 = jax.random.split(key, 4)
    W1, b1 = linear(k1, state_size, fc1_units)
    W2, b2 = linear(k2, fc1_units, fc2_units)
    Wc, bc = linear(k3, fc2_units, 1)
    Wa, ba = linear(k4, fc2_units, action_size)
    return dict(W1=W1, b1=b1, W2=W2, b2=b2, Wc=Wc, bc=bc, Wa=Wa, ba=ba)


def _reference_forward(state, p):
    h1 = jnp.maximum(state @ p["W1"] + p["b1"], 0.0)
    h2 = jnp.maximum(h1 @ p["W2"] + p["b2"], 0.0)
    critic = h2 @ p["Wc"] + p["bc"]
    adv = h2 @ p["Wa"] + p["ba"]
    return critic + adv - jnp.mean(adv, axis=1, keepdims=True)


if __name__ == "__main__":
    key = jax.random.PRNGKey(0)
    k_params, k_state = jax.random.split(key)

    batch = 8
    state_size = 32
    action_size = 16
    fc1_units = 64
    fc2_units = 64

    params = init_params(k_params, state_size, action_size, fc1_units, fc2_units)
    state = jax.random.normal(k_state, (batch, state_size), dtype=jnp.float32)

    q = qnetwork_forward(state, params)
    q = jax.block_until_ready(q)

    q_ref = _reference_forward(state, params)
    assert q.shape == (batch, action_size)
    assert jnp.allclose(q, q_ref, atol=1e-5, rtol=1e-5)

    # Also exercise the batch-tiled ("parallel" grid) path once with a larger B.
    big_B = 1024
    big_state = jax.random.normal(jax.random.PRNGKey(1),
                                  (big_B, state_size), dtype=jnp.float32)
    q_big = jax.block_until_ready(qnetwork_forward(big_state, params))
    q_big_ref = _reference_forward(big_state, params)
    assert q_big.shape == (big_B, action_size)
    assert jnp.allclose(q_big, q_big_ref, atol=1e-5, rtol=1e-5)

    print("KERNEL_OK")
</pallas_src>

<mosaic_0001>
module attributes {stable_mosaic.version = 11 : i64} {
  func.func @_qnet_kernel(%arg0: i32, %arg1: memref<8x32xf32, #tpu.memory_space<vmem>>, %arg2: memref<32x64xf32, #tpu.memory_space<vmem>>, %arg3: memref<1x64xf32, #tpu.memory_space<vmem>>, %arg4: memref<64x64xf32, #tpu.memory_space<vmem>>, %arg5: memref<1x64xf32, #tpu.memory_space<vmem>>, %arg6: memref<64x17xf32, #tpu.memory_space<vmem>>, %arg7: memref<1x17xf32, #tpu.memory_space<vmem>>, %arg8: memref<8x16xf32, #tpu.memory_space<vmem>>) attributes {dimension_semantics = [#tpu.dimension_semantics<parallel>], iteration_bounds = array<i64: 1>, scalar_prefetch = 0 : i64, scratch_operands = 0 : i64, tpu.core_type = #tpu.core_type<tc>, window_params = [{transform_indices = @transform_0, window_bounds = array<i64: 8, 32>}, {pipeline_mode = #tpu.pipeline_mode<synchronous>, transform_indices = @transform_1, window_bounds = array<i64: 32, 64>}, {pipeline_mode = #tpu.pipeline_mode<synchronous>, transform_indices = @transform_2, window_bounds = array<i64: 1, 64>}, {pipeline_mode = #tpu.pipeline_mode<synchronous>, transform_indices = @transform_3, window_bounds = array<i64: 64, 64>}, {pipeline_mode = #tpu.pipeline_mode<synchronous>, transform_indices = @transform_4, window_bounds = array<i64: 1, 64>}, {pipeline_mode = #tpu.pipeline_mode<synchronous>, transform_indices = @transform_5, window_bounds = array<i64: 64, 17>}, {pipeline_mode = #tpu.pipeline_mode<synchronous>, transform_indices = @transform_6, window_bounds = array<i64: 1, 17>}, {transform_indices = @transform_7, window_bounds = array<i64: 8, 16>}]} {
    %c0 = arith.constant 0 : index
    %c0_0 = arith.constant 0 : index
    %0 = vector.load %arg1[%c0, %c0_0] : memref<8x32xf32, #tpu.memory_space<vmem>>, vector<8x32xf32>
    %c0_1 = arith.constant 0 : index
    %c0_2 = arith.constant 0 : index
    %1 = vector.load %arg2[%c0_1, %c0_2] : memref<32x64xf32, #tpu.memory_space<vmem>>, vector<32x64xf32>
    %cst = arith.constant dense<0.000000e+00> : vector<8x64xf32>
    %2 = tpu.matmul %0, %1, %cst {dimension_numbers = #tpu.dot_dimension_numbers<[1], [0], [0], [1], [0, 0, 1, 1], [], []>} : vector<8x32xf32>, vector<32x64xf32>, vector<8x64xf32> -> vector<8x64xf32>
    %c0_3 = arith.constant 0 : index
    %c0_4 = arith.constant 0 : index
    %3 = vector.load %arg3[%c0_3, %c0_4] : memref<1x64xf32, #tpu.memory_space<vmem>>, vector<1x64xf32>
    %4 = vector.broadcast %3 : vector<1x64xf32> to vector<8x64xf32>
    %5 = arith.addf %2, %4 : vector<8x64xf32>
    %cst_5 = arith.constant 0.000000e+00 : f32
    %6 = vector.broadcast %cst_5 : f32 to vector<8x64xf32>
    %7 = arith.maximumf %5, %6 : vector<8x64xf32>
    %c0_6 = arith.constant 0 : index
    %c0_7 = arith.constant 0 : index
    %8 = vector.load %arg4[%c0_6, %c0_7] : memref<64x64xf32, #tpu.memory_space<vmem>>, vector<64x64xf32>
    %cst_8 = arith.constant dense<0.000000e+00> : vector<8x64xf32>
    %9 = tpu.matmul %7, %8, %cst_8 {dimension_numbers = #tpu.dot_dimension_numbers<[1], [0], [0], [1], [0, 0, 1, 1], [], []>} : vector<8x64xf32>, vector<64x64xf32>, vector<8x64xf32> -> vector<8x64xf32>
    %c0_9 = arith.constant 0 : index
    %c0_10 = arith.constant 0 : index
    %10 = vector.load %arg5[%c0_9, %c0_10] : memref<1x64xf32, #tpu.memory_space<vmem>>, vector<1x64xf32>
    %11 = vector.broadcast %10 : vector<1x64xf32> to vector<8x64xf32>
    %12 = arith.addf %9, %11 : vector<8x64xf32>
    %cst_11 = arith.constant 0.000000e+00 : f32
    %13 = vector.broadcast %cst_11 : f32 to vector<8x64xf32>
    %14 = arith.maximumf %12, %13 : vector<8x64xf32>
    %c0_12 = arith.constant 0 : index
    %c0_13 = arith.constant 0 : index
    %15 = vector.load %arg6[%c0_12, %c0_13] : memref<64x17xf32, #tpu.memory_space<vmem>>, vector<64x17xf32>
    %cst_14 = arith.constant dense<0.000000e+00> : vector<8x17xf32>
    %16 = tpu.matmul %14, %15, %cst_14 {dimension_numbers = #tpu.dot_dimension_numbers<[1], [0], [0], [1], [0, 0, 1, 1], [], []>} : vector<8x64xf32>, vector<64x17xf32>, vector<8x17xf32> -> vector<8x17xf32>
    %c0_15 = arith.constant 0 : index
    %c0_16 = arith.constant 0 : index
    %17 = vector.load %arg7[%c0_15, %c0_16] : memref<1x17xf32, #tpu.memory_space<vmem>>, vector<1x17xf32>
    %18 = vector.broadcast %17 : vector<1x17xf32> to vector<8x17xf32>
    %19 = arith.addf %16, %18 : vector<8x17xf32>
    %20 = vector.extract_strided_slice %19 {offsets = [0, 0], sizes = [8, 16], strides = [1, 1]} : vector<8x17xf32> to vector<8x16xf32>
    %21 = vector.extract_strided_slice %19 {offsets = [0, 16], sizes = [8, 1], strides = [1, 1]} : vector<8x17xf32> to vector<8x1xf32>
    %cst_17 = arith.constant dense<0.000000e+00> : vector<8xf32>
    %22 = vector.multi_reduction <add>, %20, %cst_17 [1] : vector<8x16xf32> to vector<8xf32>
    %23 = vector.shape_cast %22 : vector<8xf32> to vector<8x1xf32>
    %cst_18 = arith.constant 1.600000e+01 : f32
    %24 = vector.broadcast %cst_18 : f32 to vector<8x1xf32>
    %25 = arith.divf %23, %24 : vector<8x1xf32>
    %26 = vector.broadcast %21 : vector<8x1xf32> to vector<8x16xf32>
    %27 = arith.addf %26, %20 : vector<8x16xf32>
    %28 = vector.broadcast %25 : vector<8x1xf32> to vector<8x16xf32>
    %29 = arith.subf %27, %28 : vector<8x16xf32>
    %c0_19 = arith.constant 0 : index
    %c0_20 = arith.constant 0 : index
    %30 = vector.load %arg8[%c0_19, %c0_20] : memref<8x16xf32, #tpu.memory_space<vmem>>, vector<8x16xf32>
    tpu.vector_store %arg8[%c0_19, %c0_20], %29 {strides = array<i32>} : memref<8x16xf32, #tpu.memory_space<vmem>>, vector<8x16xf32>,
    return
  }
  func.func @transform_0(%arg0: i32) -> (i32, i32) {
    %c0_i32 = arith.constant 0 : i32
    %c0_i32_0 = arith.constant 0 : i32
    return %arg0, %c0_i32 : i32, i32
  }
  func.func @transform_1(%arg0: i32) -> (i32, i32) {
    %c0_i32 = arith.constant 0 : i32
    %c0_i32_0 = arith.constant 0 : i32
    %c0_i32_1 = arith.constant 0 : i32
    return %c0_i32, %c0_i32_0 : i32, i32
  }
  func.func @transform_2(%arg0: i32) -> (i32, i32) {
    %c0_i32 = arith.constant 0 : i32
    %c0_i32_0 = arith.constant 0 : i32
    %c0_i32_1 = arith.constant 0 : i32
    return %c0_i32, %c0_i32_0 : i32, i32
  }
  func.func @transform_3(%arg0: i32) -> (i32, i32) {
    %c0_i32 = arith.constant 0 : i32
    %c0_i32_0 = arith.constant 0 : i32
    %c0_i32_1 = arith.constant 0 : i32
    return %c0_i32, %c0_i32_0 : i32, i32
  }
  func.func @transform_4(%arg0: i32) -> (i32, i32) {
    %c0_i32 = arith.constant 0 : i32
    %c0_i32_0 = arith.constant 0 : i32
    %c0_i32_1 = arith.constant 0 : i32
    return %c0_i32, %c0_i32_0 : i32, i32
  }
  func.func @transform_5(%arg0: i32) -> (i32, i32) {
    %c0_i32 = arith.constant 0 : i32
    %c0_i32_0 = arith.constant 0 : i32
    %c0_i32_1 = arith.constant 0 : i32
    return %c0_i32, %c0_i32_0 : i32, i32
  }
  func.func @transform_6(%arg0: i32) -> (i32, i32) {
    %c0_i32 = arith.constant 0 : i32
    %c0_i32_0 = arith.constant 0 : i32
    %c0_i32_1 = arith.constant 0 : i32
    return %c0_i32, %c0_i32_0 : i32, i32
  }
  func.func @transform_7(%arg0: i32) -> (i32, i32) {
    %c0_i32 = arith.constant 0 : i32
    %c0_i32_0 = arith.constant 0 : i32
    return %arg0, %c0_i32 : i32, i32
  }
}

</mosaic_0001>

<bundles_post_ra>
// kernel: tpu_custom_call.1
= control target key start
LH: loop header
LB: loop body
LE: loop exit
PB: predicated region body
PF: predicated region fallthrough
CT: control target
= control target key end

     0   :  { %12 = vsyncpa [#allocation3], 0  ;;  %s638_s0 = inlined_call_operand.hbm [shape: f32[8,32], index: 0, kind: input, shape index: {}]   ;;  %s639_s1 = inlined_call_operand.vmem [shape: f32[32,64], index: 1, kind: input, shape index: {}]   ;;  %s640_s2 = inlined_call_operand.vmem [shape: f32[1,64], index: 2, kind: input, shape index: {}]   ;;  %s641_s3 = inlined_call_operand.vmem [shape: f32[64,64], index: 3, kind: input, shape index: {}]   ;;  %s642_s4 = inlined_call_operand.vmem [shape: f32[1,64], index: 4, kind: input, shape index: {}]   ;;  %s643_s5 = inlined_call_operand.vmem [shape: f32[64,17], index: 5, kind: input, shape index: {}]   ;;  %s644_s6 = inlined_call_operand.vmem [shape: f32[1,17], index: 6, kind: input, shape index: {}]   ;;  %s645_s7 = inlined_call_operand.hbm [shape: f32[8,16], index: 7, kind: output, shape index: {}]  }
   0x1   :  { %13 = vsyncpa [#allocation4], 0  ;;  %s496_s24 = smov [#allocation2]   ;;  %s448_s28 = scalar_lea.hbm %s638_s0, 128 }
   0x2   :  { %s20_s25 = sshll.u32 %s496_s24, 4  ;;  %p449_p0 = scmp.ne.s32.totalorder %s638_s0, %s448_s28  ;;  %s21_s25 = int_to_ptr.vmem [resolvable:$true] %s20_s25 }
   0x3   :  { %p452_p1 = scmp.lt.u32.totalorder %s448_s28, %s638_s0 }
   0x5   :  { %p454_p2 = pnand %p452_p1, %p449_p0 }
   0x7   :  { %457 = shalt.err (!%p454_p2)
}
   0x8   :  { %s458_s10 = scalar_lea.vmem %s21_s25, 128  ;;  %p463_p4 = scmp.lt.s32.totalorder %s21_s25, %s21_s25 }
   0x9   :  { %p459_p3 = scmp.ne.s32.totalorder %s21_s25, %s458_s10  ;;  %p464_p5 = scmp.lt.s32.totalorder %s458_s10, %s458_s10 }
   0xb   :  { %p465_p6 = por %p464_p5, %p463_p4 }
   0xd   :  { %p466_p7 = pnand %p465_p6, %p459_p3 }
   0xf   :  { %469 = shalt.err (!%p466_p7)
}
  0x10   :  { %23 = dma.hbm_to_vmem [thread:$0]  %s638_s0, 128, %s21_s25, [#allocation3]  }
  0x11   :  { %492 = dma.done.wait [#allocation3], 128  }
  0x12   :  { %493 = vsyncadd [#allocation3], 4294967168  ;;  %v497_v0 = vmov 0.0|0.0   ;;  %vm498_vm0 = vmmov 0   ;;  %v499_v1 = vmov 0.0   ;;  %v40_v2 = vld [vmem:[%s639_s1] sm:$0xff] }
  0x13   :  { %411 = vmatprep.subr.bf16.mxu0 %v497_v0  ;;  %370 = vmatprep.mubr.msk.f32.mxu0 %vm498_vm0, %v499_v1  ;;  %v41_v3 = vld [vmem:[%s639_s1 + $0x8] sm:$0xff]  ;;  %v42_v4 = vld [vmem:[%s639_s1 + $0x10] sm:$0xff]  ;;  %v43_v6 = vld [vmem:[%s639_s1 + $0x18] sm:$0xff]  ;;  %vm51_vm1 = vcmask 261120   ;;  %vm141_vm2 = vcmask 523264   ;;  %v500_v43 = vmov 16  }
  0x14   :  { %417 = vmatprep.subr.bf16.mxu1 %v497_v0  ;;  %389 = vmatprep.mubr.msk.f32.mxu1 %vm498_vm0, %v499_v1  ;;  %v412_v5 = vpack.c.bf16 %v41_v3, %v40_v2  ;;  %v126_v7 = vld [vmem:[%s641_s3] sm:$0xff]  ;;  %v127_v8 = vld [vmem:[%s641_s3 + $0x8] sm:$0xff]  ;;  %v128_v9 = vld [vmem:[%s641_s3 + $0x10] sm:$0xff]  ;;  %v415_v11 = vpack.c.bf16 %v43_v6, %v42_v4  ;;  %vm304_vm3 = vcmask 130048  }
  0x15   :  { %v129_v10 = vld [vmem:[%s641_s3 + $0x18] sm:$0xff]  ;;  %v418_v12 = vpack.c.bf16 %v127_v8, %v126_v7  ;;  %v130_v14 = vld [vmem:[%s641_s3 + $0x20] sm:$0xff]  ;;  %v131_v15 = vld [vmem:[%s641_s3 + $0x28] sm:$0xff]  ;;  %447 = vset.pattern.permute.xlu0 %v500_v43 }
  0x16   :  { %413 = vmatpush3.bf16.msra.mxu0 %v412_v5  ;;  %v421_v13 = vpack.c.bf16 %v129_v10, %v128_v9  ;;  %v39_v16 = vld [vmem:[#allocation2] sm:$0xff]  ;;  %v424_v17 = vpack.c.bf16 %v131_v15, %v130_v14  ;;  %v132_v18 = vld [vmem:[%s641_s3 + $0x30] sm:$0xff]  ;;  %v133_v19 = vld [vmem:[%s641_s3 + $0x38] sm:$0xff] }
  0x17   :  { %414 = vmatprep.subr.bf16.mxu0 %v497_v0  ;;  %419 = vmatpush3.bf16.msra.mxu1 %v418_v12  ;;  %v427_v20 = vpack.c.bf16 %v133_v19, %v132_v18  ;;  %v216_v21 = vld [vmem:[%s643_s5] sm:$0xff]  ;;  %v217_v22 = vld [vmem:[%s643_s5 + $0x8] sm:$0xff]  ;;  %v218_v23 = vld [vmem:[%s643_s5 + $0x10] sm:$0xff] }
  0x18   :  { %420 = vmatprep.subr.bf16.mxu1 %v497_v0  ;;  %v430_v24 = vpack.c.bf16 %v217_v22, %v216_v21  ;;  %v219_v25 = vld [vmem:[%s643_s5 + $0x18] sm:$0xff]  ;;  %v220_v27 = vld [vmem:[%s643_s5 + $0x20] sm:$0xff]  ;;  %v221_v28 = vld [vmem:[%s643_s5 + $0x28] sm:$0xff] }
  0x19   :  { %v433_v26 = vpack.c.bf16 %v219_v25, %v218_v23  ;;  %v436_v29 = vpack.c.bf16 %v221_v28, %v220_v27  ;;  %v333_v30 = vld [vmem:[%s640_s2] ss:$0 sm:$0xff]  ;;  %v222_v35 = vld [vmem:[%s643_s5 + $0x30] sm:$0xff]  ;;  %v223_v36 = vld [vmem:[%s643_s5 + $0x38] sm:$0xff] }
  0x1a   :  { %416 = vmatpush3.bf16.msra.mxu0 %v415_v11  ;;  %v439_v37 = vpack.c.bf16 %v223_v36, %v222_v35  ;;  %v335_v38 = vld [vmem:[%s642_s4] ss:$0 sm:$0xff]  ;;  %s501_s4 = smov [#allocation5]  }
  0x1b   :  { %429 = vmatprep.subr.bf16.mxu0 %v497_v0  ;;  %422 = vmatpush3.bf16.msra.mxu1 %v421_v13  ;;  %v337_v44 = vld [vmem:[%s644_s6] ss:$0 sm:$0xff]  ;;  %s324_s5 = sshll.u32 %s501_s4, 4  ;;  %s325_s5 = int_to_ptr.vmem [resolvable:$true] %s324_s5 }
  0x1c   :  { %423 = vmatprep.subr.bf16.mxu1 %v497_v0  ;;  %s470_s30 = scalar_lea.vmem %s325_s5, 128  ;;  %p475_p9 = scmp.lt.s32.totalorder %s325_s5, %s325_s5 }
  0x1d   :  { %371 = vmatmul.mubr.msk.f32.vlgmr.msra.gmra.mrb[0].mxu0 %vm51_vm1, %v39_v16  ;;  %p471_p8 = scmp.ne.s32.totalorder %s325_s5, %s470_s30  ;;  %p476_p10 = scmp.lt.s32.totalorder %s470_s30, %s470_s30 }
  0x1e   :  { %408 = vmatprep.mubr.msk.f32.mxu0 %vm498_vm0, %v499_v1  ;;  %431 = vmatpush3.bf16.msra.mxu0 %v430_v24 }
  0x1f   :  { %425 = vmatpush3.bf16.msra.mxu1 %v424_v17  ;;  %432 = vmatprep.subr.bf16.mxu0 %v497_v0  ;;  %p477_p11 = por %p476_p10, %p475_p9 }
  0x20   :  { %426 = vmatprep.subr.bf16.mxu1 %v497_v0 }
  0x21   :  { %p478_p12 = pnand %p477_p11, %p471_p8 }
  0x22   :  { %434 = vmatpush3.bf16.msra.mxu0 %v433_v26 }
  0x23   :  { %428 = vmatpush3.bf16.msra.mxu1 %v427_v20  ;;  %435 = vmatprep.subr.bf16.mxu0 %v497_v0 }
  0x26   :  { %437 = vmatpush3.bf16.msra.mxu0 %v436_v29 }
  0x27   :  { %438 = vmatprep.subr.bf16.mxu0 %v497_v0 }
  0x2a   :  { %440 = vmatpush3.bf16.msra.mxu0 %v439_v37 }
  0xf0   :  { %v121_v31 = vpop.f32.mrb[0].mxu0 }
  0xf1   :  { %v122_v32 = vadd.f32 %v333_v30, %v121_v31  ;;  %v372_v33 = vpop.f32.mrb[1].mxu0 }
  0xf3   :  { %v125_v34 = vmax.f32 %v122_v32, 0.0 }
  0xf5   :  { %390 = vmatmul.mubr.msk.f32.vlgmr.msra.gmra.mrb[0].mxu1 %vm141_vm2, %v125_v34 }
 0x1c8   :  { %v211_v39 = vpop.f32.mrb[0].mxu1 }
 0x1c9   :  { %v212_v40 = vadd.f32 %v335_v38, %v211_v39  ;;  %v391_v41 = vpop.f32.mrb[1].mxu1 }
 0x1cb   :  { %v215_v42 = vmax.f32 %v212_v40, 0.0 }
 0x1cd   :  { %409 = vmatmul.mubr.msk.f32.vlgmr.msra.gmra.mrb[2].mxu0 %vm141_vm2, %v215_v42 }
 0x2a0   :  { %v300_v45 = vpop.f32.mrb[2].mxu0 }
 0x2a1   :  { %v301_v46 = vadd.f32 %v337_v44, %v300_v45  ;;  %v410_v47 = vpop.f32.mrb[3].mxu0 }
 0x2a3   :  { %v305_v48 = vsel %vm304_vm3, %v301_v46, 0.0 }
 0x2a4   :  { %306 = vadd.xlane.f32.xlu0 %v305_v48 }
 0x2ba   :  { %312 = vperm.xlu0 %447, %v301_v46  }
 0x331   :  { %v307_v49 = vpop.xlane.xlu0 %306 }
 0x332   :  { %v309_v51 = vmul.f32 0.0625, %v307_v49 }
 0x339   :  { %v313_v50 = vpop.permute.xlu0 %312 }
 0x33a   :  { %v315_v52 = vadd.f32 %v313_v50, %v301_v46 }
 0x33c   :  { %v316_v53 = vsub.f32 %v315_v52, %v309_v51 }
 0x33e   :  { %317 = vst.msk [vmem:[#allocation5] sm:$0xff] %vm304_vm3, %v316_v53 }
 0x33f   :  { %481 = shalt.err (!%p478_p12)
}
 0x340   :  { %s482_s9 = scalar_lea.hbm %s645_s7, 128 }
 0x341   :  { %p483_p13 = scmp.ne.s32.totalorder %s645_s7, %s482_s9  ;;  %p486_p0 = scmp.lt.u32.totalorder %s482_s9, %s645_s7 }
 0x343   :  { %p488_p1 = pnand %p486_p0, %p483_p13 }
 0x345   :  { %491 = shalt.err (!%p488_p1)
}
 0x346   :  { %327 = dma.vmem_to_hbm [thread:$0]  %s325_s5, 128, %s645_s7, [#allocation4]  }
 0x347   :  { %494 = dma.done.wait [#allocation4], 128  }
 0x348   :  { %495 = vsyncadd [#allocation4], 4294967168 }
 0x349   :  { %331 = vsyncpa [#allocation3], 1 }
 0x34a   :  { %332 = vsyncpa [#allocation4], 1 }

</bundles_post_ra>
